<compile_context>
chip_gen: v7x
topology: tpu7x:2x2x1
jax: 0.10.0
libtpu: 0.0.40
codegen_flags: <defaults>
</compile_context>

<pallas_src>
import jax
import jax.numpy as jnp
from jax.experimental import pallas as pl
from jax.experimental.pallas import tpu as pltpu

LANE = 128


def _round_up(x, m):
    return (x + m - 1) // m * m


def _vmem_limit_bytes():
    """Physical VMEM minus headroom; falls back to a safe 56 MiB."""
    try:
        cap = pltpu.get_tpu_info().vmem_capacity_bytes
    except Exception:
        cap = 64 * 1024 * 1024
    return max(int(cap) - 8 * 1024 * 1024, 32 * 1024 * 1024)


# ----------------------------- Pallas kernel -----------------------------

def _fused_gcn_kernel(a_ref, x_ref, w_ref, b_ref, o_ref, h_ref):
    """One grid step == one GraphConv layer; A_hat and H stay resident in VMEM.

    a_ref : (Np, Np)      bf16  normalized adjacency (constant block -> DMA'd once)
    x_ref : (Np, Fp)      bf16  padded input features (constant block -> DMA'd once)
    w_ref : (1, Fp, Fp)   bf16  this layer's padded weight
    b_ref : (1, 1, Fp)    f32   this layer's padded bias
    o_ref : (Np, Fp)      f32   final logits (written on the last layer only)
    h_ref : (Np, Fp)      bf16  VMEM scratch: activation carried across layers

    Padding invariant: padded rows/cols of A_hat and padded cols of W/b are zero,
    so padded lanes never leak into real outputs (padded H rows only ever multiply
    zero A_hat columns).
    """
    layer = pl.program_id(0)
    n_layers = pl.num_programs(0)

    # Load the (already bf16) input features into the resident H buffer once.
    @pl.when(layer == 0)
    def _():
        h_ref[...] = x_ref[...]

    # Feature transform on the MXU (bf16 inputs, f32 accumulation).
    hw = jnp.dot(h_ref[...], w_ref[0], preferred_element_type=jnp.float32)
    # Neighborhood aggregation with the sym-normalized dense adjacency (MXU).
    agg = jnp.dot(a_ref[...], hw.astype(jnp.bfloat16),
                  preferred_element_type=jnp.float32)
    out = agg + b_ref[0]                      # (1, Fp) broadcasts over nodes (f32)

    # Next layer's input = ReLU(out); skipped on the last layer (dead write).
    @pl.when(layer < n_layers - 1)
    def _():
        h_ref[...] = jnp.maximum(out, 0.0).astype(jnp.bfloat16)

    # Last GraphConv has activation=None -> store the un-activated result.
    @pl.when(layer == n_layers - 1)
    def _():
        o_ref[...] = out.astype(o_ref.dtype)


# ----------------------------- wrapper -----------------------------

def gcn_forward(a_hat, features, params):
    """Mirrors GCN.forward: ReLU on all but last layer; dropout = identity (eval)."""
    # TODO(synk): nn.Dropout(p) in training mode (RNG mask); identity in eval mode.
    n, f_in = features.shape
    depth = len(params)
    n_classes = params[-1][0].shape[1]

    f_dims = [f_in] + [w.shape[1] for w, _ in params]
    f_pad = _round_up(max(max(f_dims), LANE), LANE)   # lane-dense feature width
    n_pad = _round_up(n, LANE)                        # 128-aligned node dim (MXU K)

    # Zero-pad + cast once (plain XLA glue).  Zero padded rows/cols of A_hat and
    # zero padded W/b columns keep the real outputs identical to unpadded math.
    a_p = jnp.zeros((n_pad, n_pad), jnp.bfloat16).at[:n, :n].set(
        a_hat.astype(jnp.bfloat16))
    x_p = jnp.zeros((n_pad, f_pad), jnp.bfloat16).at[:n, :f_in].set(
        features.astype(jnp.bfloat16))
    w_stack = jnp.stack([
        jnp.zeros((f_pad, f_pad), jnp.bfloat16)
        .at[:w.shape[0], :w.shape[1]].set(w.astype(jnp.bfloat16))
        for w, _ in params])
    b_stack = jnp.stack([
        jnp.zeros((1, f_pad), jnp.float32).at[0, :b.shape[0]].set(b)
        for _, b in params])

    flops = depth * (2 * n_pad * f_pad * f_pad + 2 * n_pad * n_pad * f_pad)
    bytes_accessed = (a_p.size * 2 + x_p.size * 2 + w_stack.size * 2
                      + b_stack.size * 4 + n_pad * f_pad * 4)

    def run(single_buffer):
        def const_spec(shape, index_map):
            # Constant block index across the layer grid -> DMA'd once; single
            # buffering removes the pointless second copy of these blocks.
            if single_buffer:
                return pl.BlockSpec(shape, index_map,
                                    pipeline_mode=pl.Buffered(1))
            return pl.BlockSpec(shape, index_map)

        grid_spec = pltpu.PrefetchScalarGridSpec(
            num_scalar_prefetch=0,
            grid=(depth,),
            in_specs=[
                const_spec((n_pad, n_pad), lambda l: (0, 0)),          # A_hat (resident)
                const_spec((n_pad, f_pad), lambda l: (0, 0)),          # features (resident)
                pl.BlockSpec((1, f_pad, f_pad), lambda l: (l, 0, 0)),  # per-layer W
                pl.BlockSpec((1, 1, f_pad), lambda l: (l, 0, 0)),      # per-layer b
            ],
            out_specs=const_spec((n_pad, f_pad), lambda l: (0, 0)),
            scratch_shapes=[pltpu.VMEM((n_pad, f_pad), jnp.bfloat16)],  # resident H
        )
        return pl.pallas_call(
            _fused_gcn_kernel,
            out_shape=jax.ShapeDtypeStruct((n_pad, f_pad), jnp.float32),
            grid_spec=grid_spec,
            compiler_params=pltpu.CompilerParams(
                dimension_semantics=("arbitrary",),      # layers are sequential
                vmem_limit_bytes=_vmem_limit_bytes(),
            ),
            cost_estimate=pl.CostEstimate(
                flops=flops, transcendentals=0, bytes_accessed=bytes_accessed),
        )(a_p, x_p, w_stack, b_stack)

    try:
        out_padded = run(single_buffer=True)
    except Exception:
        # Older/alternate jax builds without Buffered(1) support for pallas_call.
        out_padded = run(single_buffer=False)

    return out_padded[:n, :n_classes]


# ----------------------------- params / graph glue -----------------------------

def init_gcn_params(key, in_feats, n_hidden, n_classes, n_layers):
    """Deterministic Xavier-uniform weights, zero biases (DGL GraphConv init)."""
    dims = [in_feats] + [n_hidden] * n_layers + [n_classes]
    params = []
    for i in range(len(dims) - 1):
        key, sub = jax.random.split(key)
        fan_in, fan_out = dims[i], dims[i + 1]
        limit = (6.0 / (fan_in + fan_out)) ** 0.5
        w = jax.random.uniform(sub, (fan_in, fan_out), jnp.float32, -limit, limit)
        b = jnp.zeros((fan_out,), jnp.float32)
        params.append((w, b))
    return params


def build_normalized_adjacency(key, n_nodes, p_edge=0.2):
    """Random symmetric graph with self-loops, sym-normalized (glue, plain JAX)."""
    key, sub = jax.random.split(key)
    upper = (jax.random.uniform(sub, (n_nodes, n_nodes)) < p_edge).astype(jnp.float32)
    adj = jnp.maximum(jnp.triu(upper, 1), jnp.triu(upper, 1).T)
    adj = adj + jnp.eye(n_nodes, dtype=jnp.float32)          # self loops
    deg = adj.sum(axis=1)
    d_inv_sqrt = jnp.where(deg > 0, 1.0 / jnp.sqrt(deg), 0.0)
    return adj * d_inv_sqrt[:, None] * d_inv_sqrt[None, :]


# ----------------------------- main -----------------------------

if __name__ == "__main__":
    key = jax.random.PRNGKey(0)
    k_graph, k_feat, k_param = jax.random.split(key, 3)

    # Small, module-consistent shapes.
    n_nodes, in_feats, n_hidden, n_classes, n_layers = 64, 16, 32, 8, 2

    a_hat = build_normalized_adjacency(k_graph, n_nodes)
    features = jax.random.normal(k_feat, (n_nodes, in_feats), jnp.float32)
    params = init_gcn_params(k_param, in_feats, n_hidden, n_classes, n_layers)

    out = gcn_forward(a_hat, features, params)
    out = jax.block_until_ready(out)

    # Sanity check against a pure-f32 JAX reference of the module math.
    # (Tolerance accounts for bf16 MXU inputs with f32 accumulation.)
    h_ref = features
    for i, (w, b) in enumerate(params):
        h_ref = a_hat @ (h_ref @ w) + b
        if i != len(params) - 1:
            h_ref = jnp.maximum(h_ref, 0.0)
    assert out.shape == (n_nodes, n_classes)
    max_err = float(jnp.max(jnp.abs(out - h_ref)))
    assert jnp.allclose(out, h_ref, atol=2e-2, rtol=2e-2), max_err

    print("KERNEL_OK")
</pallas_src>

<mosaic_0001>
module attributes {stable_mosaic.version = 11 : i64} {
  func.func @_fused_gcn_kernel(%arg0: i32, %arg1: memref<128x128xbf16, #tpu.memory_space<vmem>>, %arg2: memref<128x128xbf16, #tpu.memory_space<vmem>>, %arg3: memref<1x128x128xbf16, #tpu.memory_space<vmem>>, %arg4: memref<1x1x128xf32, #tpu.memory_space<vmem>>, %arg5: memref<128x128xf32, #tpu.memory_space<vmem>>, %arg6: memref<128x128xbf16, #tpu.memory_space<vmem>>) attributes {dimension_semantics = [#tpu.dimension_semantics<arbitrary>], iteration_bounds = array<i64: 3>, scalar_prefetch = 0 : i64, scratch_operands = 1 : i64, tpu.core_type = #tpu.core_type<tc>, window_params = [{pipeline_mode = #tpu.pipeline_mode<synchronous>, transform_indices = @transform_0, window_bounds = array<i64: 128, 128>}, {pipeline_mode = #tpu.pipeline_mode<synchronous>, transform_indices = @transform_1, window_bounds = array<i64: 128, 128>}, {transform_indices = @transform_2, window_bounds = array<i64: 1, 128, 128>}, {transform_indices = @transform_3, window_bounds = array<i64: 1, 1, 128>}, {pipeline_mode = #tpu.pipeline_mode<synchronous>, transform_indices = @transform_4, window_bounds = array<i64: 128, 128>}]} {
    %c0_i32 = arith.constant 0 : i32
    %0 = arith.cmpi eq, %arg0, %c0_i32 : i32
    %1 = arith.extui %0 : i1 to i32
    %c0_i32_0 = arith.constant 0 : i32
    %2 = arith.cmpi ne, %1, %c0_i32_0 : i32
    scf.if %2 {
      %c0_14 = arith.constant 0 : index
      %c0_15 = arith.constant 0 : index
      %20 = vector.load %arg2[%c0_14, %c0_15] : memref<128x128xbf16, #tpu.memory_space<vmem>>, vector<128x128xbf16>
      %c0_16 = arith.constant 0 : index
      %c0_17 = arith.constant 0 : index
      %21 = vector.load %arg6[%c0_16, %c0_17] : memref<128x128xbf16, #tpu.memory_space<vmem>>, vector<128x128xbf16>
      tpu.vector_store %arg6[%c0_16, %c0_17], %20 {strides = array<i32>} : memref<128x128xbf16, #tpu.memory_space<vmem>>, vector<128x128xbf16>,
    } else {
    }
    %c0 = arith.constant 0 : index
    %c0_1 = arith.constant 0 : index
    %3 = vector.load %arg6[%c0, %c0_1] : memref<128x128xbf16, #tpu.memory_space<vmem>>, vector<128x128xbf16>
    %c0_2 = arith.constant 0 : index
    %c0_3 = arith.constant 0 : index
    %c0_4 = arith.constant 0 : index
    %4 = vector.load %arg3[%c0_2, %c0_3, %c0_4] : memref<1x128x128xbf16, #tpu.memory_space<vmem>>, vector<1x128x128xbf16>
    %5 = vector.shape_cast %4 : vector<1x128x128xbf16> to vector<128x128xbf16>
    %cst = arith.constant dense<0.000000e+00> : vector<128x128xf32>
    %6 = tpu.matmul %3, %5, %cst {dimension_numbers = #tpu.dot_dimension_numbers<[1], [0], [0], [1], [0, 0, 1, 1], [], []>} : vector<128x128xbf16>, vector<128x128xbf16>, vector<128x128xf32> -> vector<128x128xf32>
    %c0_5 = arith.constant 0 : index
    %c0_6 = arith.constant 0 : index
    %7 = vector.load %arg1[%c0_5, %c0_6] : memref<128x128xbf16, #tpu.memory_space<vmem>>, vector<128x128xbf16>
    %8 = arith.truncf %6 : vector<128x128xf32> to vector<128x128xbf16>
    %cst_7 = arith.constant dense<0.000000e+00> : vector<128x128xf32>
    %9 = tpu.matmul %7, %8, %cst_7 {dimension_numbers = #tpu.dot_dimension_numbers<[1], [0], [0], [1], [0, 0, 1, 1], [], []>} : vector<128x128xbf16>, vector<128x128xbf16>, vector<128x128xf32> -> vector<128x128xf32>
    %c0_8 = arith.constant 0 : index
    %c0_9 = arith.constant 0 : index
    %c0_10 = arith.constant 0 : index
    %10 = vector.load %arg4[%c0_8, %c0_9, %c0_10] : memref<1x1x128xf32, #tpu.memory_space<vmem>>, vector<1x1x128xf32>
    %11 = vector.shape_cast %10 : vector<1x1x128xf32> to vector<1x128xf32>
    %12 = vector.broadcast %11 : vector<1x128xf32> to vector<128x128xf32>
    %13 = arith.addf %9, %12 : vector<128x128xf32>
    %c2_i32 = arith.constant 2 : i32
    %14 = arith.cmpi slt, %arg0, %c2_i32 : i32
    %15 = arith.extui %14 : i1 to i32
    %c0_i32_11 = arith.constant 0 : i32
    %16 = arith.cmpi ne, %15, %c0_i32_11 : i32
    scf.if %16 {
      %cst_14 = arith.constant 0.000000e+00 : f32
      %20 = vector.broadcast %cst_14 : f32 to vector<128x128xf32>
      %21 = arith.maximumf %13, %20 : vector<128x128xf32>
      %22 = arith.truncf %21 : vector<128x128xf32> to vector<128x128xbf16>
      %c0_15 = arith.constant 0 : index
      %c0_16 = arith.constant 0 : index
      %23 = vector.load %arg6[%c0_15, %c0_16] : memref<128x128xbf16, #tpu.memory_space<vmem>>, vector<128x128xbf16>
      tpu.vector_store %arg6[%c0_15, %c0_16], %22 {strides = array<i32>} : memref<128x128xbf16, #tpu.memory_space<vmem>>, vector<128x128xbf16>,
    } else {
    }
    %c2_i32_12 = arith.constant 2 : i32
    %17 = arith.cmpi eq, %arg0, %c2_i32_12 : i32
    %18 = arith.extui %17 : i1 to i32
    %c0_i32_13 = arith.constant 0 : i32
    %19 = arith.cmpi ne, %18, %c0_i32_13 : i32
    scf.if %19 {
      %c0_14 = arith.constant 0 : index
      %c0_15 = arith.constant 0 : index
      %20 = vector.load %arg5[%c0_14, %c0_15] : memref<128x128xf32, #tpu.memory_space<vmem>>, vector<128x128xf32>
      tpu.vector_store %arg5[%c0_14, %c0_15], %13 {strides = array<i32>} : memref<128x128xf32, #tpu.memory_space<vmem>>, vector<128x128xf32>,
    } else {
    }
    return
  }
  func.func @transform_0(%arg0: i32) -> (i32, i32) {
    %c0_i32 = arith.constant 0 : i32
    %c0_i32_0 = arith.constant 0 : i32
    %c0_i32_1 = arith.constant 0 : i32
    return %c0_i32, %c0_i32_0 : i32, i32
  }
  func.func @transform_1(%arg0: i32) -> (i32, i32) {
    %c0_i32 = arith.constant 0 : i32
    %c0_i32_0 = arith.constant 0 : i32
    %c0_i32_1 = arith.constant 0 : i32
    return %c0_i32, %c0_i32_0 : i32, i32
  }
  func.func @transform_2(%arg0: i32) -> (i32, i32, i32) {
    %c0_i32 = arith.constant 0 : i32
    %c0_i32_0 = arith.constant 0 : i32
    %c0_i32_1 = arith.constant 0 : i32
    return %arg0, %c0_i32, %c0_i32_0 : i32, i32, i32
  }
  func.func @transform_3(%arg0: i32) -> (i32, i32, i32) {
    %c0_i32 = arith.constant 0 : i32
    %c0_i32_0 = arith.constant 0 : i32
    %c0_i32_1 = arith.constant 0 : i32
    return %arg0, %c0_i32, %c0_i32_0 : i32, i32, i32
  }
  func.func @transform_4(%arg0: i32) -> (i32, i32) {
    %c0_i32 = arith.constant 0 : i32
    %c0_i32_0 = arith.constant 0 : i32
    %c0_i32_1 = arith.constant 0 : i32
    return %c0_i32, %c0_i32_0 : i32, i32
  }
}

module attributes {stable_mosaic.version = 11 : i64} {
  func.func @_fused_gcn_kernel(%arg0: i32, %arg1: memref<128x128xbf16, #tpu.memory_space<vmem>>, %arg2: memref<128x128xbf16, #tpu.memory_space<vmem>>, %arg3: memref<1x128x128xbf16, #tpu.memory_space<vmem>>, %arg4: memref<1x1x128xf32, #tpu.memory_space<vmem>>, %arg5: memref<128x128xf32, #tpu.memory_space<vmem>>, %arg6: memref<128x128xbf16, #tpu.memory_space<vmem>>) attributes {dimension_semantics = [#tpu.dimension_semantics<arbitrary>], iteration_bounds = array<i64: 3>, scalar_prefetch = 0 : i64, scratch_operands = 1 : i64, tpu.core_type = #tpu.core_type<tc>, window_params = [{pipeline_mode = #tpu.pipeline_mode<synchronous>, transform_indices = @transform_0, window_bounds = array<i64: 128, 128>}, {pipeline_mode = #tpu.pipeline_mode<synchronous>, transform_indices = @transform_1, window_bounds = array<i64: 128, 128>}, {transform_indices = @transform_2, window_bounds = array<i64: 1, 128, 128>}, {transform_indices = @transform_3, window_bounds = array<i64: 1, 1, 128>}, {pipeline_mode = #tpu.pipeline_mode<synchronous>, transform_indices = @transform_4, window_bounds = array<i64: 128, 128>}]} {
    %c0_i32 = arith.constant 0 : i32
    %0 = arith.cmpi eq, %arg0, %c0_i32 : i32
    %1 = arith.extui %0 : i1 to i32
    %c0_i32_0 = arith.constant 0 : i32
    %2 = arith.cmpi ne, %1, %c0_i32_0 : i32
    scf.if %2 {
      %c0_14 = arith.constant 0 : index
      %c0_15 = arith.constant 0 : index
      %20 = vector.load %arg2[%c0_14, %c0_15] : memref<128x128xbf16, #tpu.memory_space<vmem>>, vector<128x128xbf16>
      %c0_16 = arith.constant 0 : index
      %c0_17 = arith.constant 0 : index
      %21 = vector.load %arg6[%c0_16, %c0_17] : memref<128x128xbf16, #tpu.memory_space<vmem>>, vector<128x128xbf16>
      tpu.vector_store %arg6[%c0_16, %c0_17], %20 {strides = array<i32>} : memref<128x128xbf16, #tpu.memory_space<vmem>>, vector<128x128xbf16>,
    } else {
    }
    %c0 = arith.constant 0 : index
    %c0_1 = arith.constant 0 : index
    %3 = vector.load %arg6[%c0, %c0_1] : memref<128x128xbf16, #tpu.memory_space<vmem>>, vector<128x128xbf16>
    %c0_2 = arith.constant 0 : index
    %c0_3 = arith.constant 0 : index
    %c0_4 = arith.constant 0 : index
    %4 = vector.load %arg3[%c0_2, %c0_3, %c0_4] : memref<1x128x128xbf16, #tpu.memory_space<vmem>>, vector<1x128x128xbf16>
    %5 = vector.shape_cast %4 : vector<1x128x128xbf16> to vector<128x128xbf16>
    %cst = arith.constant dense<0.000000e+00> : vector<128x128xf32>
    %6 = tpu.matmul %3, %5, %cst {dimension_numbers = #tpu.dot_dimension_numbers<[1], [0], [0], [1], [0, 0, 1, 1], [], []>} : vector<128x128xbf16>, vector<128x128xbf16>, vector<128x128xf32> -> vector<128x128xf32>
    %c0_5 = arith.constant 0 : index
    %c0_6 = arith.constant 0 : index
    %7 = vector.load %arg1[%c0_5, %c0_6] : memref<128x128xbf16, #tpu.memory_space<vmem>>, vector<128x128xbf16>
    %8 = arith.truncf %6 : vector<128x128xf32> to vector<128x128xbf16>
    %cst_7 = arith.constant dense<0.000000e+00> : vector<128x128xf32>
    %9 = tpu.matmul %7, %8, %cst_7 {dimension_numbers = #tpu.dot_dimension_numbers<[1], [0], [0], [1], [0, 0, 1, 1], [], []>} : vector<128x128xbf16>, vector<128x128xbf16>, vector<128x128xf32> -> vector<128x128xf32>
    %c0_8 = arith.constant 0 : index
    %c0_9 = arith.constant 0 : index
    %c0_10 = arith.constant 0 : index
    %10 = vector.load %arg4[%c0_8, %c0_9, %c0_10] : memref<1x1x128xf32, #tpu.memory_space<vmem>>, vector<1x1x128xf32>
    %11 = vector.shape_cast %10 : vector<1x1x128xf32> to vector<1x128xf32>
    %12 = vector.broadcast %11 : vector<1x128xf32> to vector<128x128xf32>
    %13 = arith.addf %9, %12 : vector<128x128xf32>
    %c2_i32 = arith.constant 2 : i32
    %14 = arith.cmpi slt, %arg0, %c2_i32 : i32
    %15 = arith.extui %14 : i1 to i32
    %c0_i32_11 = arith.constant 0 : i32
    %16 = arith.cmpi ne, %15, %c0_i32_11 : i32
    scf.if %16 {
      %cst_14 = arith.constant 0.000000e+00 : f32
      %20 = vector.broadcast %cst_14 : f32 to vector<128x128xf32>
      %21 = arith.maximumf %13, %20 : vector<128x128xf32>
      %22 = arith.truncf %21 : vector<128x128xf32> to vector<128x128xbf16>
      %c0_15 = arith.constant 0 : index
      %c0_16 = arith.constant 0 : index
      %23 = vector.load %arg6[%c0_15, %c0_16] : memref<128x128xbf16, #tpu.memory_space<vmem>>, vector<128x128xbf16>
      tpu.vector_store %arg6[%c0_15, %c0_16], %22 {strides = array<i32>} : memref<128x128xbf16, #tpu.memory_space<vmem>>, vector<128x128xbf16>,
    } else {
    }
    %c2_i32_12 = arith.constant 2 : i32
    %17 = arith.cmpi eq, %arg0, %c2_i32_12 : i32
    %18 = arith.extui %17 : i1 to i32
    %c0_i32_13 = arith.constant 0 : i32
    %19 = arith.cmpi ne, %18, %c0_i32_13 : i32
    scf.if %19 {
      %c0_14 = arith.constant 0 : index
      %c0_15 = arith.constant 0 : index
      %20 = vector.load %arg5[%c0_14, %c0_15] : memref<128x128xf32, #tpu.memory_space<vmem>>, vector<128x128xf32>
      tpu.vector_store %arg5[%c0_14, %c0_15], %13 {strides = array<i32>} : memref<128x128xf32, #tpu.memory_space<vmem>>, vector<128x128xf32>,
    } else {
    }
    return
  }
  func.func @transform_0(%arg0: i32) -> (i32, i32) {
    %c0_i32 = arith.constant 0 : i32
    %c0_i32_0 = arith.constant 0 : i32
    %c0_i32_1 = arith.constant 0 : i32
    return %c0_i32, %c0_i32_0 : i32, i32
  }
  func.func @transform_1(%arg0: i32) -> (i32, i32) {
    %c0_i32 = arith.constant 0 : i32
    %c0_i32_0 = arith.constant 0 : i32
    %c0_i32_1 = arith.constant 0 : i32
    return %c0_i32, %c0_i32_0 : i32, i32
  }
  func.func @transform_2(%arg0: i32) -> (i32, i32, i32) {
    %c0_i32 = arith.constant 0 : i32
    %c0_i32_0 = arith.constant 0 : i32
    %c0_i32_1 = arith.constant 0 : i32
    return %arg0, %c0_i32, %c0_i32_0 : i32, i32, i32
  }
  func.func @transform_3(%arg0: i32) -> (i32, i32, i32) {
    %c0_i32 = arith.constant 0 : i32
    %c0_i32_0 = arith.constant 0 : i32
    %c0_i32_1 = arith.constant 0 : i32
    return %arg0, %c0_i32, %c0_i32_0 : i32, i32, i32
  }
  func.func @transform_4(%arg0: i32) -> (i32, i32) {
    %c0_i32 = arith.constant 0 : i32
    %c0_i32_0 = arith.constant 0 : i32
    %c0_i32_1 = arith.constant 0 : i32
    return %c0_i32, %c0_i32_0 : i32, i32
  }
}

</mosaic_0001>

<bundles_post_ra>
// kernel: tpu_custom_call.1
= control target key start
LH: loop header
LB: loop body
LE: loop exit
PB: predicated region body
PF: predicated region fallthrough
CT: control target
= control target key end

     0   :  { %9 = vsyncpa [#allocation4], 0  ;;  %s1490_s0 = inlined_call_operand.hbm [shape: bf16[128,128], index: 0, kind: input, shape index: {}]   ;;  %s1491_s1 = inlined_call_operand.hbm [shape: bf16[128,128], index: 1, kind: input, shape index: {}]   ;;  %s1492_s2 = inlined_call_operand.hbm [shape: bf16[3,128,128], index: 2, kind: input, shape index: {}]   ;;  %s1493_s3 = inlined_call_operand.vmem [shape: f32[3,1,128], index: 3, kind: input, shape index: {}]   ;;  %s1494_s4 = inlined_call_operand.hbm [shape: f32[128,128], index: 4, kind: output, shape index: {}]  }
   0x1   :  { %10 = vsyncpa [#allocation7], 0 }
   0x2   :  { %11 = vsyncpa [#allocation5], 0  ;;  %s1239_s15 = smov 0   ;;  %s1241_s16 = smov 0  }
   0x3   :  { %s1243_s17 = smov 0   ;;  %s1245_s18 = smov 0  }
   0x4 LB: > { %s1258_s19 = sadd.s32 4294967295, %s1204_s18   ;;  %s1261_s20 = sadd.s32 1, %s1204_s18   ;;  %s1204_s18 = sphi %s1245_s18, %s1515_s18   ;;  %s1200_s17 = sphi %s1243_s17, %s1514_s17   ;;  %s1196_s16 = sphi %s1241_s16, %s1513_s16   ;;  %s1192_s15 = sphi %s1239_s15, %s1512_s15  }
   0x5   : > { %s63_s21 = ssub.s32 %s1204_s18, %s1261_s20  ;;  %s66_s22 = sadd.s32 1, %s1200_s17 }
   0x6   : > { %p64_p0 = scmp.eq.s32.totalorder %s63_s21, 0  ;;  %p73_p1 = scmp.ne.s32.totalorder %s1200_s17, %s1196_s16 }
   0x7   : > { %p74_p2 = scmp.eq.s32.totalorder %s1204_s18, 0  ;;  %p79_p3 = scmp.ne.s32.totalorder %s1196_s16, %s1192_s15 }
   0x8   : > { %s1271_s23 = scalar_select %p64_p0, %s1200_s17, %s66_s22  }
   0x9   : > { %p1273_p4 = por %p74_p2, %p73_p1  ;;  %p1495_p5 = scmp.eq.s32.totalorder %s1258_s19, 0 }
   0xa   : > { %p811_p6 = scmp.ge.s32.totalorder %s1204_s18, 1  ;;  %p137_p7 = scmp.lt.s32.totalorder %s1204_s18, 4 }
   0xb   : > { %p1282_p8 = por %p1495_p5, %p79_p3  ;;  %s1206_s27 = smov [#allocation3]  }
   0xc   : > { %p1287_p10 = pnand %p811_p6, %p137_p7  ;;  %s149_s28 = sshll.u32 %s1206_s27, 4  ;;  %s150_s28 = int_to_ptr.vmem [resolvable:$true] %s149_s28 }
   0xd   : > { %s1500_s25 = scalar_select %p1282_p8, 1, 0 }
   0xe   : > { %s1501_s26 = scalar_select %p1287_p10, 1, 0 }
   0xf   : > { %p965_p11 = pneg %p1287_p10  ;;  %p978_p13 = scmp.lt.s32.totalorder %s1204_s18, 3 }
  0x10   : > { %s1046_s7 = scalar_lea.hbm %s1490_s0, 1024 }
  0x11   : > { %p1295_p12 = pnand %p965_p11, %p1495_p5  ;;  %p1302_p0 = pnand %p978_p13, %p1273_p4 }
  0x12   : > { %p1047_p1 = scmp.ne.s32.totalorder %s1490_s0, %s1046_s7  ;;  %p1053_p4 = scmp.lt.u32.totalorder %s1046_s7, %s1490_s0 }
  0x13   : > { %s1503_s30 = scalar_select %p1302_p0, 1, 0 }
  0x14   : > { %p1048_p2 = pneg %p1295_p12 }
  0x16   : > { %p1049_p3 = pnand %p1048_p2, %p1047_p1 }
  0x18   : > { %p1050_p6 = pneg %p1049_p3 }
  0x1a   : > { %p1055_p7 = pnand %p1053_p4, %p1050_p6 }
  0x1c   : > { %1058 = shalt.err (!%p1055_p7)
}
  0x1d   : > { %s1059_s12 = scalar_lea.vmem %s150_s28, 1024  ;;  %p1067_p5 = scmp.lt.s32.totalorder %s150_s28, %s150_s28 }
  0x1e   : > { %p1060_p11 = scmp.ne.s32.totalorder %s150_s28, %s1059_s12  ;;  %p1068_p8 = scmp.lt.s32.totalorder %s1059_s12, %s1059_s12 }
  0x20   : > { %p1062_p13 = pnand %p1060_p11, %p1048_p2  ;;  %p1069_p10 = por %p1068_p8, %p1067_p5 }
  0x22   : > { %p1063_p9 = pneg %p1062_p13 }
  0x24   : > { %p1070_p0 = pnand %p1069_p10, %p1063_p9 }
  0x26   : > { %1073 = shalt.err (!%p1070_p0)
}
  0x27   : > { %s1207_s13 = smov 64   ;;  %s1208_s14 = smov 4  }
  0x28   : > { %968 = dma.hbm_to_vmem [thread:$0]  (!%p1295_p12), %s1490_s0, 1024, %s150_s28, [#allocation4], %s1207_s13, %s1207_s13, %s1208_s14  }
  0x29   : > { %s1209_s22 = smov [#allocation6]   ;;  %s176_s27 = sand.u32 1, %s1204_s18  }
  0x2a   : > { %s162_s24 = sshll.u32 %s1209_s22, 4  ;;  %s1074_s7 = scalar_lea.hbm %s1491_s1, 1024  ;;  %s163_s24 = int_to_ptr.vmem [resolvable:$true] %s162_s24 }
  0x2b   : > { %p1075_p5 = scmp.ne.s32.totalorder %s1491_s1, %s1074_s7  ;;  %p1081_p10 = scmp.lt.u32.totalorder %s1074_s7, %s1491_s1 }
  0x2d   : > { %p1077_p8 = pnand %p1075_p5, %p1048_p2 }
  0x2f   : > { %p1078_p9 = pneg %p1077_p8 }
  0x31   : > { %p1083_p0 = pnand %p1081_p10, %p1078_p9 }
  0x33   : > { %1086 = shalt.err (!%p1083_p0)
}
  0x34   : > { %s1087_s28 = scalar_lea.vmem %s163_s24, 1024  ;;  %p1095_p4 = scmp.lt.s32.totalorder %s163_s24, %s163_s24 }
  0x35   : > { %p1088_p1 = scmp.ne.s32.totalorder %s163_s24, %s1087_s28  ;;  %p1096_p7 = scmp.lt.s32.totalorder %s1087_s28, %s1087_s28 }
  0x37   : > { %p1090_p3 = pnand %p1088_p1, %p1048_p2  ;;  %p1097_p11 = por %p1096_p7, %p1095_p4 }
  0x39   : > { %p1091_p6 = pneg %p1090_p3 }
  0x3b   : > { %p1098_p13 = pnand %p1097_p11, %p1091_p6 }
  0x3d   : > { %1101 = shalt.err (!%p1098_p13)
}
  0x3e   : > { %971 = dma.hbm_to_vmem [thread:$0]  (!%p1295_p12), %s1491_s1, 1024, %s163_s24, [#allocation7], %s1207_s13, %s1207_s13, %s1208_s14  }
  0x3f   : > { %s178_s21 = sand.u32 1, %s1200_s17   ;;  %s854_s22 = sshll.u32 %s1204_s18, 10 }
  0x40   : > { %s815_s5 = sshll.u32 %s178_s21, 6  ;;  %s1360_s8 = scalar_lea.hbm %s1492_s2, %s854_s22 }
  0x41   : > { %s180_s29 = scalar_lea.vmem [#allocation8], %s815_s5  ;;  %s1364_s10 = scalar_lea.sflag [#allocation4], %s176_s27 }
  0x42   : > { %s187_s9 = sshll.u32 %s180_s29, 4  ;;  %s1102_s11 = scalar_lea.hbm %s1360_s8, 1024  ;;  %s1362_s9 = int_to_ptr.vmem [resolvable:$true] %s187_s9 }
  0x43   : > { %p1103_p12 = scmp.ne.s32.totalorder %s1360_s8, %s1102_s11  ;;  %p1504_p2 = scmp.ne.s32.totalorder %s1503_s30, 0 }
  0x44   : > { %s1107_s28 = scalar_lea.hbm %s1492_s2, 3072  ;;  %p1108_p10 = scmp.lt.u32.totalorder %s1360_s8, %s1492_s2 }
  0x45   : > { %p1104_p5 = pneg %p1504_p2  ;;  %p1109_p0 = scmp.lt.u32.totalorder %s1107_s28, %s1102_s11 }
  0x46   : > { %p1111_p3 = scmp.lt.u32.totalorder %s1102_s11, %s1360_s8 }
  0x47   : > { %p1105_p8 = pnand %p1104_p5, %p1103_p12  ;;  %p1110_p1 = por %p1109_p0, %p1108_p10 }
  0x49   : > { %p1106_p9 = pneg %p1105_p8  ;;  %p1112_p6 = por %p1111_p3, %p1110_p1 }
  0x4b   : > { %p1113_p4 = pnand %p1112_p6, %p1106_p9 }
  0x4d   : > { %1116 = shalt.err (!%p1113_p4)
}
  0x4e   : > { %s1117_s27 = scalar_lea.vmem %s1362_s9, 1024  ;;  %s1210_s21 = smov [#allocation8]  }
  0x4f   : > { %p1118_p7 = scmp.ne.s32.totalorder %s1362_s9, %s1117_s27  ;;  %s1122_s22 = sshll.u32 %s1210_s21, 4  ;;  %s1123_s22 = int_to_ptr.vmem [resolvable:$false] %s1122_s22 }
  0x50   : > { %s1124_s5 = scalar_lea.vmem %s1123_s22, 2048  ;;  %p1125_p12 = scmp.lt.s32.totalorder %s1362_s9, %s1123_s22 }
  0x51   : > { %p1120_p11 = pnand %p1118_p7, %p1104_p5  ;;  %p1126_p8 = scmp.lt.s32.totalorder %s1124_s5, %s1117_s27 }
  0x53   : > { %p1121_p13 = pneg %p1120_p11  ;;  %p1127_p10 = por %p1126_p8, %p1125_p12 }
  0x55   : > { %p1128_p0 = pnand %p1127_p10, %p1121_p13 }
  0x57   : > { %1131 = shalt.err (!%p1128_p0)
}
  0x58   : > { %975 = dma.hbm_to_vmem [thread:$0]  (!%p1504_p2), %s1360_s8, 1024, %s1362_s9, %s1364_s10, %s1207_s13, %s1207_s13, %s1208_s14  }
  0x59   : > { %p1505_p5 = scmp.ne.s32.totalorder %s1501_s26, 0 }
  0x5a   : > { %p1506_p9 = scmp.eq.s32.totalorder (!%p1505_p5), %s1258_s19, 0 }
  0x5b   : > { %205 = sbr.rel (%p1505_p5) target bundleno = 681 (0x2a9), region = 36 }
  0x62   : > { %1175 = dma.done.wait (%p1506_p9), [#allocation4], 1024   ;;  %p1507_p1 = pmov %p1506_p9 }
  0x64   : > { %1177 = vsyncadd (%p1507_p1), [#allocation4], 4294966272  ;;  %p1508_p3 = pmov %p1507_p1 }
  0x65   : > { %p1509_p6 = pmov %p1507_p1 }
  0x66   : > { %1179 = dma.done.wait (%p1508_p3), [#allocation7], 1024  }
  0x67   : > { %1181 = vsyncadd (%p1509_p6), [#allocation7], 4294966272  ;;  %s215_s30 = sand.u32 1, %s1258_s19   ;;  %s217_s13 = sand.u32 1, %s1196_s16  }
  0x68   : > { %s821_s14 = sshll.u32 %s217_s13, 6  ;;  %s216_s26 = scalar_lea.sflag [#allocation4], %s215_s30 }
  0x69   : > { %s1407_s6 = scalar_lea.vmem [#allocation8], %s821_s14  ;;  %p1510_p2 = scmp.ne.s32.totalorder %s1500_s25, 0 }
  0x6b   : > { %1183 = dma.done.wait (%p1510_p2), %s216_s26, 1024  }
  0x6c   : > { %1185 = vsyncadd (%p1510_p2), %s216_s26, 4294966272  ;;  %p242_p4 = scmp.lt.s32.totalorder %s1258_s19, 2  ;;  %p1511_p7 = scmp.ne.s32.totalorder %s1258_s19, 0 }
  0x6d   : > { %v1022_v0 = vld [vmem:[#allocation6] sm:$0xff] (!%p1511_p7)   ;;  %v1023_v1 = vld [vmem:[#allocation6 + $0x8] sm:$0xff] (!%p1511_p7)   ;;  %v1024_v2 = vld [vmem:[#allocation6 + $0x10] sm:$0xff] (!%p1511_p7)  }
  0x6e   : > { %s1415_s7 = scalar_select %p242_p4, %s1258_s19, 2 }
  0x6f   : > { %249 = sbr.rel (%p1511_p7) target bundleno = 118 (0x76), region = 52  ;;  %314 = vst [vmem:[#allocation2] sm:$0xff] (!%p1511_p7), %v1022_v0  ;;  %315 = vst [vmem:[#allocation2 + $0x8] sm:$0xff] (!%p1511_p7), %v1023_v1  ;;  %v1025_v3 = vld [vmem:[#allocation6 + $0x18] sm:$0xff] (!%p1511_p7)   ;;  %v1026_v4 = vld [vmem:[#allocation6 + $0x20] sm:$0xff] (!%p1511_p7)  }
  0x70   : > { %s244_s9 = scalar_lea.vmem %s1493_s3, %s1415_s7  ;;  %316 = vst [vmem:[#allocation2 + $0x10] sm:$0xff] (!%p1511_p7), %v1024_v2  ;;  %317 = vst [vmem:[#allocation2 + $0x18] sm:$0xff] (!%p1511_p7), %v1025_v3  ;;  %v1027_v5 = vld [vmem:[#allocation6 + $0x28] sm:$0xff] (!%p1511_p7)   ;;  %v1028_v6 = vld [vmem:[#allocation6 + $0x30] sm:$0xff] (!%p1511_p7)  }
  0x71   : > { %318 = vst [vmem:[#allocation2 + $0x20] sm:$0xff] (!%p1511_p7), %v1026_v4  ;;  %319 = vst [vmem:[#allocation2 + $0x28] sm:$0xff] (!%p1511_p7), %v1027_v5  ;;  %v1029_v7 = vld [vmem:[#allocation6 + $0x38] sm:$0xff] (!%p1511_p7)  }
  0x72   : > { %320 = vst [vmem:[#allocation2 + $0x30] sm:$0xff] (!%p1511_p7), %v1028_v6  ;;  %321 = vst [vmem:[#allocation2 + $0x38] sm:$0xff] (!%p1511_p7), %v1029_v7 }
  0x76 PF: > { %v1030_v8 = vld [vmem:[%s1407_s6] sm:$0xff]   ;;  %v1031_v9 = vld [vmem:[%s1407_s6 + $0x8] sm:$0xff]   ;;  %v1032_v10 = vld [vmem:[%s1407_s6 + $0x10] sm:$0xff]   ;;  %p848_p11 = scmp.ge.s32.totalorder %s1258_s19, 2 }
  0x77   : > { %887 = vmatprep.subr.bf16.mxu0 %v1030_v8  ;;  %v1033_v11 = vld [vmem:[%s1407_s6 + $0x18] sm:$0xff]   ;;  %v322_v12 = vld [vmem:[#allocation2] sm:$0xff]  ;;  %v1035_v14 = vld [vmem:[%s1407_s6 + $0x28] sm:$0xff]  }
  0x78   : > { %888 = vmatpush3.bf16.msra.mxu0 %v1030_v8  ;;  %903 = vmatprep.mubr.bf16.mxu0 %v322_v12  ;;  %v1034_v13 = vld [vmem:[%s1407_s6 + $0x20] sm:$0xff]   ;;  %v1036_v15 = vld [vmem:[%s1407_s6 + $0x30] sm:$0xff]   ;;  %v1037_v16 = vld [vmem:[%s1407_s6 + $0x38] sm:$0xff]  }
  0x79   : > { %889 = vmatprep.subr.bf16.mxu0 %v1031_v9  ;;  %v323_v17 = vld [vmem:[#allocation2 + $0x8] sm:$0xff]  ;;  %v324_v18 = vld [vmem:[#allocation2 + $0x10] sm:$0xff]  ;;  %v325_v19 = vld [vmem:[#allocation2 + $0x18] sm:$0xff] }
  0x7a   : > { %v326_v20 = vld [vmem:[#allocation2 + $0x20] sm:$0xff]  ;;  %v327_v21 = vld [vmem:[#allocation2 + $0x28] sm:$0xff]  ;;  %v328_v22 = vld [vmem:[#allocation2 + $0x30] sm:$0xff] }
  0x7b   : > { %v329_v23 = vld [vmem:[#allocation2 + $0x38] sm:$0xff]  ;;  %v1038_v24 = vld [vmem:[#allocation3] sm:$0xff]   ;;  %v1039_v49 = vld [vmem:[#allocation3 + $0x8] sm:$0xff]  }
  0x7c   : > { %890 = vmatpush3.bf16.msra.mxu0 %v1031_v9  ;;  %935 = vmatprep.mubr.bf16.mxu1 %v1038_v24  ;;  %v1040_v50 = vld [vmem:[#allocation3 + $0x10] sm:$0xff]   ;;  %v1041_v51 = vld [vmem:[#allocation3 + $0x18] sm:$0xff]   ;;  %v1042_v52 = vld [vmem:[#allocation3 + $0x20] sm:$0xff]  }
  0x7d   : > { %891 = vmatprep.subr.bf16.mxu0 %v1032_v10  ;;  %v1043_v53 = vld [vmem:[#allocation3 + $0x28] sm:$0xff]   ;;  %v1044_v54 = vld [vmem:[#allocation3 + $0x30] sm:$0xff]   ;;  %v1045_v55 = vld [vmem:[#allocation3 + $0x38] sm:$0xff]  }
  0x7e   : > { %v839_v56 = vld [vmem:[%s244_s9] ss:$0 sm:$0xff] }
  0x80   : > { %892 = vmatpush3.bf16.msra.mxu0 %v1032_v10 }
  0x81   : > { %893 = vmatprep.subr.bf16.mxu0 %v1033_v11 }
  0x84   : > { %894 = vmatpush3.bf16.msra.mxu0 %v1033_v11 }
  0x85   : > { %895 = vmatprep.subr.bf16.mxu0 %v1034_v13 }
  0x88   : > { %896 = vmatpush3.bf16.msra.mxu0 %v1034_v13 }
  0x89   : > { %897 = vmatprep.subr.bf16.mxu0 %v1035_v14 }
  0x8c   : > { %898 = vmatpush3.bf16.msra.mxu0 %v1035_v14 }
  0x8d   : > { %899 = vmatprep.subr.bf16.mxu0 %v1036_v15 }
  0x90   : > { %900 = vmatpush3.bf16.msra.mxu0 %v1036_v15 }
  0x91   : > { %901 = vmatprep.subr.bf16.mxu0 %v1037_v16 }
  0x94   : > { %902 = vmatpush3.bf16.msra.mxu0 %v1037_v16 }
  0x97   : > { %904 = vmatmul.mubr.bf16.vlgmr.msra.gmra.mrb[0].mxu0 %v323_v17 }
  0x98   : > { %907 = vmatprep.mubr.bf16.mxu0 %v324_v18 }
  0x9f   : > { %908 = vmatmul.mubr.bf16.gmra.mrb[4].mxu0 %v325_v19 }
  0xa0   : > { %911 = vmatprep.mubr.bf16.mxu0 %v326_v20 }
  0xa7   : > { %912 = vmatmul.mubr.bf16.gmra.mrb[8].mxu0 %v327_v21 }
  0xa8   : > { %915 = vmatprep.mubr.bf16.mxu0 %v328_v22 }
  0xaf   : > { %916 = vmatmul.mubr.bf16.gmra.mrb[12].mxu0 %v329_v23 }
 0x16a   : > { %v905_v25 = vpop.f32.mrb[0].mxu0 }
 0x16b   : > { %v428_v26 = vpop.f32.mrb[1].mxu0 }
 0x16c   : > { %v906_v27 = vpop.f32.mrb[2].mxu0 }
 0x16d   : > { %v508_v28 = vpack.c.bf16 %v906_v27, %v905_v25  ;;  %v431_v29 = vpop.f32.mrb[3].mxu0 }
 0x16e   : > { %v507_v30 = vpack.c.bf16 %v431_v29, %v428_v26 }
 0x170   : > { %919 = vmatprep.subr.bf16.mxu1 %v507_v30 }
 0x171   : > { %920 = vmatpush3.bf16.msra.mxu1 %v507_v30 }
 0x172   : > { %v909_v31 = vpop.f32.mrb[4].mxu0  ;;  %921 = vmatprep.subr.bf16.mxu1 %v508_v28 }
 0x173   : > { %v444_v32 = vpop.f32.mrb[5].mxu0 }
 0x174   : > { %v910_v33 = vpop.f32.mrb[6].mxu0 }
 0x175   : > { %v510_v34 = vpack.c.bf16 %v910_v33, %v909_v31  ;;  %v447_v35 = vpop.f32.mrb[7].mxu0  ;;  %922 = vmatpush3.bf16.msra.mxu1 %v508_v28 }
 0x176   : > { %v509_v36 = vpack.c.bf16 %v447_v35, %v444_v32 }
 0x178   : > { %923 = vmatprep.subr.bf16.mxu1 %v509_v36 }
 0x179   : > { %924 = vmatpush3.bf16.msra.mxu1 %v509_v36 }
 0x17a   : > { %v913_v37 = vpop.f32.mrb[8].mxu0  ;;  %925 = vmatprep.subr.bf16.mxu1 %v510_v34 }
 0x17b   : > { %v460_v38 = vpop.f32.mrb[9].mxu0 }
 0x17c   : > { %v914_v39 = vpop.f32.mrb[10].mxu0 }
 0x17d   : > { %v512_v40 = vpack.c.bf16 %v914_v39, %v913_v37  ;;  %v463_v41 = vpop.f32.mrb[11].mxu0  ;;  %926 = vmatpush3.bf16.msra.mxu1 %v510_v34 }
 0x17e   : > { %v511_v42 = vpack.c.bf16 %v463_v41, %v460_v38 }
 0x180   : > { %927 = vmatprep.subr.bf16.mxu1 %v511_v42 }
 0x181   : > { %928 = vmatpush3.bf16.msra.mxu1 %v511_v42 }
 0x182   : > { %v917_v43 = vpop.f32.mrb[12].mxu0  ;;  %929 = vmatprep.subr.bf16.mxu1 %v512_v40 }
 0x183   : > { %v476_v44 = vpop.f32.mrb[13].mxu0 }
 0x184   : > { %v918_v45 = vpop.f32.mrb[14].mxu0 }
 0x185   : > { %v514_v46 = vpack.c.bf16 %v918_v45, %v917_v43  ;;  %v479_v47 = vpop.f32.mrb[15].mxu0  ;;  %930 = vmatpush3.bf16.msra.mxu1 %v512_v40 }
 0x186   : > { %v513_v48 = vpack.c.bf16 %v479_v47, %v476_v44 }
 0x188   : > { %931 = vmatprep.subr.bf16.mxu1 %v513_v48 }
 0x189   : > { %932 = vmatpush3.bf16.msra.mxu1 %v513_v48 }
 0x18a   : > { %933 = vmatprep.subr.bf16.mxu1 %v514_v46 }
 0x18d   : > { %934 = vmatpush3.bf16.msra.mxu1 %v514_v46 }
 0x190   : > { %936 = vmatmul.mubr.bf16.vlgmr.msra.gmra.mrb[0].mxu1 %v1039_v49 }
 0x191   : > { %939 = vmatprep.mubr.bf16.mxu1 %v1040_v50 }
 0x198   : > { %940 = vmatmul.mubr.bf16.gmra.mrb[4].mxu1 %v1041_v51 }
 0x199   : > { %943 = vmatprep.mubr.bf16.mxu1 %v1042_v52 }
 0x1a0   : > { %944 = vmatmul.mubr.bf16.gmra.mrb[8].mxu1 %v1043_v53 }
 0x1a1   : > { %947 = vmatprep.mubr.bf16.mxu1 %v1044_v54 }
 0x1a8   : > { %948 = vmatmul.mubr.bf16.gmra.mrb[12].mxu1 %v1045_v55 }
 0x263   : > { %v937_v57 = vpop.f32.mrb[0].mxu1 }
 0x264   : > { %v1436_v58 = vadd.f32 %v937_v57, %v839_v56  ;;  %v604_v59 = vpop.f32.mrb[1].mxu1 }
 0x265   : > { %v1438_v60 = vadd.f32 %v839_v56, %v604_v59  ;;  %v938_v61 = vpop.f32.mrb[2].mxu1 }
 0x266   : > { %v1440_v62 = vadd.f32 %v938_v61, %v839_v56  ;;  %v607_v63 = vpop.f32.mrb[3].mxu1  ;;  %v673_v27 = vmax.f32 (!%p848_p11), %v1436_v58, 0.0 }
 0x267   : > { %v608_v0 = vadd.f32 %v839_v56, %v607_v63  ;;  %v671_v25 = vmax.f32 (!%p848_p11), %v1438_v60, 0.0 }
 0x268   : > { %v674_v28 = vmax.f32 (!%p848_p11), %v1440_v62, 0.0 }
 0x269   : > { %v672_v26 = vmax.f32 (!%p848_p11), %v608_v0, 0.0 }
 0x26a   : > { %v688_v34 = vpack.c.bf16 (!%p848_p11), %v674_v28, %v673_v27 }
 0x26b   : > { %v941_v1 = vpop.f32.mrb[4].mxu1  ;;  %v687_v33 = vpack.c.bf16 (!%p848_p11), %v672_v26, %v671_v25 }
 0x26c   : > { %v1442_v2 = vadd.f32 %v941_v1, %v839_v56  ;;  %v620_v3 = vpop.f32.mrb[5].mxu1  ;;  %696 = vst [vmem:[#allocation2 + $0x8] sm:$0xff] (!%p848_p11), %v688_v34 }
 0x26d   : > { %v621_v4 = vadd.f32 %v839_v56, %v620_v3  ;;  %v942_v5 = vpop.f32.mrb[6].mxu1  ;;  %695 = vst [vmem:[#allocation2] sm:$0xff] (!%p848_p11), %v687_v33 }
 0x26e   : > { %v632_v6 = vadd.f32 %v942_v5, %v839_v56  ;;  %v623_v7 = vpop.f32.mrb[7].mxu1  ;;  %v677_v31 = vmax.f32 (!%p848_p11), %v1442_v2, 0.0 }
 0x26f   : > { %v624_v8 = vadd.f32 %v839_v56, %v623_v7  ;;  %v675_v29 = vmax.f32 (!%p848_p11), %v621_v4, 0.0 }
 0x270   : > { %v678_v32 = vmax.f32 (!%p848_p11), %v632_v6, 0.0 }
 0x271   : > { %v676_v30 = vmax.f32 (!%p848_p11), %v624_v8, 0.0 }
 0x272   : > { %v690_v38 = vpack.c.bf16 (!%p848_p11), %v678_v32, %v677_v31 }
 0x273   : > { %v945_v9 = vpop.f32.mrb[8].mxu1  ;;  %v689_v37 = vpack.c.bf16 (!%p848_p11), %v676_v30, %v675_v29 }
 0x274   : > { %v645_v10 = vadd.f32 %v945_v9, %v839_v56  ;;  %v636_v11 = vpop.f32.mrb[9].mxu1  ;;  %698 = vst [vmem:[#allocation2 + $0x18] sm:$0xff] (!%p848_p11), %v690_v38 }
 0x275   : > { %v637_v12 = vadd.f32 %v839_v56, %v636_v11  ;;  %v946_v13 = vpop.f32.mrb[10].mxu1  ;;  %697 = vst [vmem:[#allocation2 + $0x10] sm:$0xff] (!%p848_p11), %v689_v37 }
 0x276   : > { %v648_v14 = vadd.f32 %v946_v13, %v839_v56  ;;  %v639_v15 = vpop.f32.mrb[11].mxu1  ;;  %v681_v39 = vmax.f32 (!%p848_p11), %v645_v10, 0.0 }
 0x277   : > { %v640_v16 = vadd.f32 %v839_v56, %v639_v15  ;;  %v679_v35 = vmax.f32 (!%p848_p11), %v637_v12, 0.0 }
 0x278   : > { %v682_v40 = vmax.f32 (!%p848_p11), %v648_v14, 0.0 }
 0x279   : > { %670 = sbr.rel (%p848_p11) target bundleno = 646 (0x286), region = 56  ;;  %v680_v36 = vmax.f32 (!%p848_p11), %v640_v16, 0.0 }
 0x27a   : > { %v692_v45 = vpack.c.bf16 (!%p848_p11), %v682_v40, %v681_v39 }
 0x27b   : > { %v949_v17 = vpop.f32.mrb[12].mxu1  ;;  %v691_v41 = vpack.c.bf16 (!%p848_p11), %v680_v36, %v679_v35 }
 0x27c   : > { %v661_v18 = vadd.f32 %v949_v17, %v839_v56  ;;  %v652_v19 = vpop.f32.mrb[13].mxu1  ;;  %700 = vst [vmem:[#allocation2 + $0x28] sm:$0xff] (!%p848_p11), %v692_v45 }
 0x27d   : > { %v653_v20 = vadd.f32 %v839_v56, %v652_v19  ;;  %v950_v21 = vpop.f32.mrb[14].mxu1  ;;  %699 = vst [vmem:[#allocation2 + $0x20] sm:$0xff] (!%p848_p11), %v691_v41 }
 0x27e   : > { %v664_v22 = vadd.f32 %v950_v21, %v839_v56  ;;  %v655_v23 = vpop.f32.mrb[15].mxu1  ;;  %v685_v44 = vmax.f32 (!%p848_p11), %v661_v18, 0.0 }
 0x27f   : > { %v656_v24 = vadd.f32 %v839_v56, %v655_v23  ;;  %v683_v42 = vmax.f32 (!%p848_p11), %v653_v20, 0.0 }
 0x280   : > { %v686_v46 = vmax.f32 %v664_v22, 0.0 }
 0x281   : > { %v684_v43 = vmax.f32 %v656_v24, 0.0 }
 0x282   : > { %v694_v48 = vpack.c.bf16 %v686_v46, %v685_v44 }
 0x283   : > { %v693_v47 = vpack.c.bf16 %v684_v43, %v683_v42 }
 0x284   : > { %702 = vst [vmem:[#allocation2 + $0x38] sm:$0xff] %v694_v48 }
 0x285   : > { %701 = vst [vmem:[#allocation2 + $0x30] sm:$0xff] %v693_v47 }
 0x286 PF: > { %p849_p13 = scmp.ne.s32.totalorder %s1258_s19, 2 }
 0x287   : > { %707 = vst [vmem:[#allocation9] sm:$0xff] (!%p849_p13), %v1438_v60  ;;  %708 = vst [vmem:[#allocation9 + $0x8] sm:$0xff] (!%p849_p13), %v608_v0 }
 0x288   : > { %706 = sbr.rel (%p849_p13) target bundleno = 655 (0x28f), region = 60  ;;  %709 = vst [vmem:[#allocation9 + $0x10] sm:$0xff] (!%p849_p13), %v1436_v58  ;;  %710 = vst [vmem:[#allocation9 + $0x18] sm:$0xff] (!%p849_p13), %v1440_v62 }
 0x289   : > { %711 = vst [vmem:[#allocation9 + $0x20] sm:$0xff] (!%p849_p13), %v621_v4  ;;  %712 = vst [vmem:[#allocation9 + $0x28] sm:$0xff] (!%p849_p13), %v624_v8 }
 0x28a   : > { %713 = vst [vmem:[#allocation9 + $0x30] sm:$0xff] (!%p849_p13), %v1442_v2  ;;  %714 = vst [vmem:[#allocation9 + $0x38] sm:$0xff] (!%p849_p13), %v632_v6 }
 0x28b   : > { %715 = vst [vmem:[#allocation9 + $0x40] sm:$0xff] (!%p849_p13), %v637_v12  ;;  %716 = vst [vmem:[#allocation9 + $0x48] sm:$0xff] (!%p849_p13), %v640_v16 }
 0x28c   : > { %717 = vst [vmem:[#allocation9 + $0x50] sm:$0xff] (!%p849_p13), %v645_v10  ;;  %718 = vst [vmem:[#allocation9 + $0x58] sm:$0xff] (!%p849_p13), %v648_v14 }
 0x28d   : > { %719 = vst [vmem:[#allocation9 + $0x60] sm:$0xff] (!%p849_p13), %v653_v20  ;;  %720 = vst [vmem:[#allocation9 + $0x68] sm:$0xff] (!%p849_p13), %v656_v24 }
 0x28e   : > { %721 = vst [vmem:[#allocation9 + $0x70] sm:$0xff] (!%p849_p13), %v661_v18  ;;  %722 = vst [vmem:[#allocation9 + $0x78] sm:$0xff] (!%p849_p13), %v664_v22 }
 0x28f PF: > { %p981_p12 = scmp.eq.s32.totalorder %s1258_s19, 2  ;;  %s1211_s11 = smov [#allocation9]  }
 0x290   : > { %s729_s18 = sshll.u32 %s1211_s11, 4  ;;  %s730_s18 = int_to_ptr.vmem [resolvable:$true] %s729_s18 }
 0x291   : > { %s1132_s24 = scalar_lea.vmem %s730_s18, 2048  ;;  %p1139_p5 = scmp.lt.s32.totalorder %s730_s18, %s730_s18 }
 0x292   : > { %p1133_p8 = scmp.ne.s32.totalorder %s730_s18, %s1132_s24  ;;  %p1140_p9 = scmp.lt.s32.totalorder %s1132_s24, %s1132_s24 }
 0x294   : > { %p1134_p10 = pnand %p1133_p8, %p981_p12  ;;  %p1141_p1 = por %p1140_p9, %p1139_p5 }
 0x296   : > { %p1135_p0 = pneg %p1134_p10 }
 0x298   : > { %p1142_p3 = pnand %p1141_p1, %p1135_p0 }
 0x29a   : > { %1145 = shalt.err (!%p1142_p3)
}
 0x29b   : > { %s1146_s15 = scalar_lea.hbm %s1494_s4, 2048 }
 0x29c   : > { %p1147_p6 = scmp.ne.s32.totalorder %s1494_s4, %s1146_s15  ;;  %p1152_p7 = scmp.lt.u32.totalorder %s1146_s15, %s1494_s4 }
 0x29e   : > { %p1148_p2 = pnand %p1147_p6, %p981_p12 }
 0x2a0   : > { %p1149_p4 = pneg %p1148_p2 }
 0x2a2   : > { %p1154_p11 = pnand %p1152_p7, %p1149_p4 }
 0x2a4   : > { %1157 = shalt.err (!%p1154_p11)
}
 0x2a5   : > { %s1212_s30 = smov 128   ;;  %s1213_s13 = smov 8  }
 0x2a6   : > { %962 = dma.vmem_to_hbm [thread:$0]  (%p981_p12), %s730_s18, 2048, %s1494_s4, [#allocation5], %s1212_s30, %s1212_s30, %s1213_s13  }
 0x2a7   : > { %1187 = dma.done.wait (%p981_p12), [#allocation5], 2048  }
 0x2a8   : > { %1189 = vsyncadd (%p981_p12), [#allocation5], 4294965248 }
 0x2a9 PF: > { %p14_p13 = scmp.ge.s32.totalorder %s1261_s20, 5   ;;  %s1512_s15 = smov %s1196_s16 }
 0x2aa   : > { %s1513_s16 = smov %s1200_s17  ;;  %s1514_s17 = smov %s1271_s23 }
 0x2ab   : > { %s1515_s18 = smov %s1261_s20  ;;  %16 = sbr.rel (!%p14_p13) target bundleno = 4 (0x4), region = 95 }
 0x2b2   :  { %745 = vsyncpa [#allocation4], 1 }
 0x2b3   :  { %747 = vsyncpa [#allocation4 + $0x1], 1 }
 0x2b4   :  { %748 = vsyncpa [#allocation7], 1 }
 0x2b5   :  { %749 = vsyncpa [#allocation5], 1 }
 0x2b6   :  { %751 = vsyncpa [#allocation5 + $0x1], 1 }

// kernel: tpu_custom_call.1
= control target key start
LH: loop header
LB: loop body
LE: loop exit
PB: predicated region body
PF: predicated region fallthrough
CT: control target
= control target key end

     0   :  { %9 = vsyncpa [#allocation4], 0  ;;  %s1490_s0 = inlined_call_operand.hbm [shape: bf16[128,128], index: 0, kind: input, shape index: {}]   ;;  %s1491_s1 = inlined_call_operand.hbm [shape: bf16[128,128], index: 1, kind: input, shape index: {}]   ;;  %s1492_s2 = inlined_call_operand.hbm [shape: bf16[3,128,128], index: 2, kind: input, shape index: {}]   ;;  %s1493_s3 = inlined_call_operand.vmem [shape: f32[3,1,128], index: 3, kind: input, shape index: {}]   ;;  %s1494_s4 = inlined_call_operand.hbm [shape: f32[128,128], index: 4, kind: output, shape index: {}]  }
   0x1   :  { %10 = vsyncpa [#allocation7], 0 }
   0x2   :  { %11 = vsyncpa [#allocation5], 0  ;;  %s1239_s15 = smov 0   ;;  %s1241_s16 = smov 0  }
   0x3   :  { %s1243_s17 = smov 0   ;;  %s1245_s18 = smov 0  }
   0x4 LB: > { %s1258_s19 = sadd.s32 4294967295, %s1204_s18   ;;  %s1261_s20 = sadd.s32 1, %s1204_s18   ;;  %s1204_s18 = sphi %s1245_s18, %s1515_s18   ;;  %s1200_s17 = sphi %s1243_s17, %s1514_s17   ;;  %s1196_s16 = sphi %s1241_s16, %s1513_s16   ;;  %s1192_s15 = sphi %s1239_s15, %s1512_s15  }
   0x5   : > { %s63_s21 = ssub.s32 %s1204_s18, %s1261_s20  ;;  %s66_s22 = sadd.s32 1, %s1200_s17 }
   0x6   : > { %p64_p0 = scmp.eq.s32.totalorder %s63_s21, 0  ;;  %p73_p1 = scmp.ne.s32.totalorder %s1200_s17, %s1196_s16 }
   0x7   : > { %p74_p2 = scmp.eq.s32.totalorder %s1204_s18, 0  ;;  %p79_p3 = scmp.ne.s32.totalorder %s1196_s16, %s1192_s15 }
   0x8   : > { %s1271_s23 = scalar_select %p64_p0, %s1200_s17, %s66_s22  }
   0x9   : > { %p1273_p4 = por %p74_p2, %p73_p1  ;;  %p1495_p5 = scmp.eq.s32.totalorder %s1258_s19, 0 }
   0xa   : > { %p811_p6 = scmp.ge.s32.totalorder %s1204_s18, 1  ;;  %p137_p7 = scmp.lt.s32.totalorder %s1204_s18, 4 }
   0xb   : > { %p1282_p8 = por %p1495_p5, %p79_p3  ;;  %s1206_s27 = smov [#allocation3]  }
   0xc   : > { %p1287_p10 = pnand %p811_p6, %p137_p7  ;;  %s149_s28 = sshll.u32 %s1206_s27, 4  ;;  %s150_s28 = int_to_ptr.vmem [resolvable:$true] %s149_s28 }
   0xd   : > { %s1500_s25 = scalar_select %p1282_p8, 1, 0 }
   0xe   : > { %s1501_s26 = scalar_select %p1287_p10, 1, 0 }
   0xf   : > { %p965_p11 = pneg %p1287_p10  ;;  %p978_p13 = scmp.lt.s32.totalorder %s1204_s18, 3 }
  0x10   : > { %s1046_s7 = scalar_lea.hbm %s1490_s0, 1024 }
  0x11   : > { %p1295_p12 = pnand %p965_p11, %p1495_p5  ;;  %p1302_p0 = pnand %p978_p13, %p1273_p4 }
  0x12   : > { %p1047_p1 = scmp.ne.s32.totalorder %s1490_s0, %s1046_s7  ;;  %p1053_p4 = scmp.lt.u32.totalorder %s1046_s7, %s1490_s0 }
  0x13   : > { %s1503_s30 = scalar_select %p1302_p0, 1, 0 }
  0x14   : > { %p1048_p2 = pneg %p1295_p12 }
  0x16   : > { %p1049_p3 = pnand %p1048_p2, %p1047_p1 }
  0x18   : > { %p1050_p6 = pneg %p1049_p3 }
  0x1a   : > { %p1055_p7 = pnand %p1053_p4, %p1050_p6 }
  0x1c   : > { %1058 = shalt.err (!%p1055_p7)
}
  0x1d   : > { %s1059_s12 = scalar_lea.vmem %s150_s28, 1024  ;;  %p1067_p5 = scmp.lt.s32.totalorder %s150_s28, %s150_s28 }
  0x1e   : > { %p1060_p11 = scmp.ne.s32.totalorder %s150_s28, %s1059_s12  ;;  %p1068_p8 = scmp.lt.s32.totalorder %s1059_s12, %s1059_s12 }
  0x20   : > { %p1062_p13 = pnand %p1060_p11, %p1048_p2  ;;  %p1069_p10 = por %p1068_p8, %p1067_p5 }
  0x22   : > { %p1063_p9 = pneg %p1062_p13 }
  0x24   : > { %p1070_p0 = pnand %p1069_p10, %p1063_p9 }
  0x26   : > { %1073 = shalt.err (!%p1070_p0)
}
  0x27   : > { %s1207_s13 = smov 64   ;;  %s1208_s14 = smov 4  }
  0x28   : > { %968 = dma.hbm_to_vmem [thread:$0]  (!%p1295_p12), %s1490_s0, 1024, %s150_s28, [#allocation4], %s1207_s13, %s1207_s13, %s1208_s14  }
  0x29   : > { %s1209_s22 = smov [#allocation6]   ;;  %s176_s27 = sand.u32 1, %s1204_s18  }
  0x2a   : > { %s162_s24 = sshll.u32 %s1209_s22, 4  ;;  %s1074_s7 = scalar_lea.hbm %s1491_s1, 1024  ;;  %s163_s24 = int_to_ptr.vmem [resolvable:$true] %s162_s24 }
  0x2b   : > { %p1075_p5 = scmp.ne.s32.totalorder %s1491_s1, %s1074_s7  ;;  %p1081_p10 = scmp.lt.u32.totalorder %s1074_s7, %s1491_s1 }
  0x2d   : > { %p1077_p8 = pnand %p1075_p5, %p1048_p2 }
  0x2f   : > { %p1078_p9 = pneg %p1077_p8 }
  0x31   : > { %p1083_p0 = pnand %p1081_p10, %p1078_p9 }
  0x33   : > { %1086 = shalt.err (!%p1083_p0)
}
  0x34   : > { %s1087_s28 = scalar_lea.vmem %s163_s24, 1024  ;;  %p1095_p4 = scmp.lt.s32.totalorder %s163_s24, %s163_s24 }
  0x35   : > { %p1088_p1 = scmp.ne.s32.totalorder %s163_s24, %s1087_s28  ;;  %p1096_p7 = scmp.lt.s32.totalorder %s1087_s28, %s1087_s28 }
  0x37   : > { %p1090_p3 = pnand %p1088_p1, %p1048_p2  ;;  %p1097_p11 = por %p1096_p7, %p1095_p4 }
  0x39   : > { %p1091_p6 = pneg %p1090_p3 }
  0x3b   : > { %p1098_p13 = pnand %p1097_p11, %p1091_p6 }
  0x3d   : > { %1101 = shalt.err (!%p1098_p13)
}
  0x3e   : > { %971 = dma.hbm_to_vmem [thread:$0]  (!%p1295_p12), %s1491_s1, 1024, %s163_s24, [#allocation7], %s1207_s13, %s1207_s13, %s1208_s14  }
  0x3f   : > { %s178_s21 = sand.u32 1, %s1200_s17   ;;  %s854_s22 = sshll.u32 %s1204_s18, 10 }
  0x40   : > { %s815_s5 = sshll.u32 %s178_s21, 6  ;;  %s1360_s8 = scalar_lea.hbm %s1492_s2, %s854_s22 }
  0x41   : > { %s180_s29 = scalar_lea.vmem [#allocation8], %s815_s5  ;;  %s1364_s10 = scalar_lea.sflag [#allocation4], %s176_s27 }
  0x42   : > { %s187_s9 = sshll.u32 %s180_s29, 4  ;;  %s1102_s11 = scalar_lea.hbm %s1360_s8, 1024  ;;  %s1362_s9 = int_to_ptr.vmem [resolvable:$true] %s187_s9 }
  0x43   : > { %p1103_p12 = scmp.ne.s32.totalorder %s1360_s8, %s1102_s11  ;;  %p1504_p2 = scmp.ne.s32.totalorder %s1503_s30, 0 }
  0x44   : > { %s1107_s28 = scalar_lea.hbm %s1492_s2, 3072  ;;  %p1108_p10 = scmp.lt.u32.totalorder %s1360_s8, %s1492_s2 }
  0x45   : > { %p1104_p5 = pneg %p1504_p2  ;;  %p1109_p0 = scmp.lt.u32.totalorder %s1107_s28, %s1102_s11 }
  0x46   : > { %p1111_p3 = scmp.lt.u32.totalorder %s1102_s11, %s1360_s8 }
  0x47   : > { %p1105_p8 = pnand %p1104_p5, %p1103_p12  ;;  %p1110_p1 = por %p1109_p0, %p1108_p10 }
  0x49   : > { %p1106_p9 = pneg %p1105_p8  ;;  %p1112_p6 = por %p1111_p3, %p1110_p1 }
  0x4b   : > { %p1113_p4 = pnand %p1112_p6, %p1106_p9 }
  0x4d   : > { %1116 = shalt.err (!%p1113_p4)
}
  0x4e   : > { %s1117_s27 = scalar_lea.vmem %s1362_s9, 1024  ;;  %s1210_s21 = smov [#allocation8]  }
  0x4f   : > { %p1118_p7 = scmp.ne.s32.totalorder %s1362_s9, %s1117_s27  ;;  %s1122_s22 = sshll.u32 %s1210_s21, 4  ;;  %s1123_s22 = int_to_ptr.vmem [resolvable:$false] %s1122_s22 }
  0x50   : > { %s1124_s5 = scalar_lea.vmem %s1123_s22, 2048  ;;  %p1125_p12 = scmp.lt.s32.totalorder %s1362_s9, %s1123_s22 }
  0x51   : > { %p1120_p11 = pnand %p1118_p7, %p1104_p5  ;;  %p1126_p8 = scmp.lt.s32.totalorder %s1124_s5, %s1117_s27 }
  0x53   : > { %p1121_p13 = pneg %p1120_p11  ;;  %p1127_p10 = por %p1126_p8, %p1125_p12 }
  0x55   : > { %p1128_p0 = pnand %p1127_p10, %p1121_p13 }
  0x57   : > { %1131 = shalt.err (!%p1128_p0)
}
  0x58   : > { %975 = dma.hbm_to_vmem [thread:$0]  (!%p1504_p2), %s1360_s8, 1024, %s1362_s9, %s1364_s10, %s1207_s13, %s1207_s13, %s1208_s14  }
  0x59   : > { %p1505_p5 = scmp.ne.s32.totalorder %s1501_s26, 0 }
  0x5a   : > { %p1506_p9 = scmp.eq.s32.totalorder (!%p1505_p5), %s1258_s19, 0 }
  0x5b   : > { %205 = sbr.rel (%p1505_p5) target bundleno = 681 (0x2a9), region = 36 }
  0x62   : > { %1175 = dma.done.wait (%p1506_p9), [#allocation4], 1024   ;;  %p1507_p1 = pmov %p1506_p9 }
  0x64   : > { %1177 = vsyncadd (%p1507_p1), [#allocation4], 4294966272  ;;  %p1508_p3 = pmov %p1507_p1 }
  0x65   : > { %p1509_p6 = pmov %p1507_p1 }
  0x66   : > { %1179 = dma.done.wait (%p1508_p3), [#allocation7], 1024  }
  0x67   : > { %1181 = vsyncadd (%p1509_p6), [#allocation7], 4294966272  ;;  %s215_s30 = sand.u32 1, %s1258_s19   ;;  %s217_s13 = sand.u32 1, %s1196_s16  }
  0x68   : > { %s821_s14 = sshll.u32 %s217_s13, 6  ;;  %s216_s26 = scalar_lea.sflag [#allocation4], %s215_s30 }
  0x69   : > { %s1407_s6 = scalar_lea.vmem [#allocation8], %s821_s14  ;;  %p1510_p2 = scmp.ne.s32.totalorder %s1500_s25, 0 }
  0x6b   : > { %1183 = dma.done.wait (%p1510_p2), %s216_s26, 1024  }
  0x6c   : > { %1185 = vsyncadd (%p1510_p2), %s216_s26, 4294966272  ;;  %p242_p4 = scmp.lt.s32.totalorder %s1258_s19, 2  ;;  %p1511_p7 = scmp.ne.s32.totalorder %s1258_s19, 0 }
  0x6d   : > { %v1022_v0 = vld [vmem:[#allocation6] sm:$0xff] (!%p1511_p7)   ;;  %v1023_v1 = vld [vmem:[#allocation6 + $0x8] sm:$0xff] (!%p1511_p7)   ;;  %v1024_v2 = vld [vmem:[#allocation6 + $0x10] sm:$0xff] (!%p1511_p7)  }
  0x6e   : > { %s1415_s7 = scalar_select %p242_p4, %s1258_s19, 2 }
  0x6f   : > { %249 = sbr.rel (%p1511_p7) target bundleno = 118 (0x76), region = 52  ;;  %314 = vst [vmem:[#allocation2] sm:$0xff] (!%p1511_p7), %v1022_v0  ;;  %315 = vst [vmem:[#allocation2 + $0x8] sm:$0xff] (!%p1511_p7), %v1023_v1  ;;  %v1025_v3 = vld [vmem:[#allocation6 + $0x18] sm:$0xff] (!%p1511_p7)   ;;  %v1026_v4 = vld [vmem:[#allocation6 + $0x20] sm:$0xff] (!%p1511_p7)  }
  0x70   : > { %s244_s9 = scalar_lea.vmem %s1493_s3, %s1415_s7  ;;  %316 = vst [vmem:[#allocation2 + $0x10] sm:$0xff] (!%p1511_p7), %v1024_v2  ;;  %317 = vst [vmem:[#allocation2 + $0x18] sm:$0xff] (!%p1511_p7), %v1025_v3  ;;  %v1027_v5 = vld [vmem:[#allocation6 + $0x28] sm:$0xff] (!%p1511_p7)   ;;  %v1028_v6 = vld [vmem:[#allocation6 + $0x30] sm:$0xff] (!%p1511_p7)  }
  0x71   : > { %318 = vst [vmem:[#allocation2 + $0x20] sm:$0xff] (!%p1511_p7), %v1026_v4  ;;  %319 = vst [vmem:[#allocation2 + $0x28] sm:$0xff] (!%p1511_p7), %v1027_v5  ;;  %v1029_v7 = vld [vmem:[#allocation6 + $0x38] sm:$0xff] (!%p1511_p7)  }
  0x72   : > { %320 = vst [vmem:[#allocation2 + $0x30] sm:$0xff] (!%p1511_p7), %v1028_v6  ;;  %321 = vst [vmem:[#allocation2 + $0x38] sm:$0xff] (!%p1511_p7), %v1029_v7 }
  0x76 PF: > { %v1030_v8 = vld [vmem:[%s1407_s6] sm:$0xff]   ;;  %v1031_v9 = vld [vmem:[%s1407_s6 + $0x8] sm:$0xff]   ;;  %v1032_v10 = vld [vmem:[%s1407_s6 + $0x10] sm:$0xff]   ;;  %p848_p11 = scmp.ge.s32.totalorder %s1258_s19, 2 }
  0x77   : > { %887 = vmatprep.subr.bf16.mxu0 %v1030_v8  ;;  %v1033_v11 = vld [vmem:[%s1407_s6 + $0x18] sm:$0xff]   ;;  %v322_v12 = vld [vmem:[#allocation2] sm:$0xff]  ;;  %v1035_v14 = vld [vmem:[%s1407_s6 + $0x28] sm:$0xff]  }
  0x78   : > { %888 = vmatpush3.bf16.msra.mxu0 %v1030_v8  ;;  %903 = vmatprep.mubr.bf16.mxu0 %v322_v12  ;;  %v1034_v13 = vld [vmem:[%s1407_s6 + $0x20] sm:$0xff]   ;;  %v1036_v15 = vld [vmem:[%s1407_s6 + $0x30] sm:$0xff]   ;;  %v1037_v16 = vld [vmem:[%s1407_s6 + $0x38] sm:$0xff]  }
  0x79   : > { %889 = vmatprep.subr.bf16.mxu0 %v1031_v9  ;;  %v323_v17 = vld [vmem:[#allocation2 + $0x8] sm:$0xff]  ;;  %v324_v18 = vld [vmem:[#allocation2 + $0x10] sm:$0xff]  ;;  %v325_v19 = vld [vmem:[#allocation2 + $0x18] sm:$0xff] }
  0x7a   : > { %v326_v20 = vld [vmem:[#allocation2 + $0x20] sm:$0xff]  ;;  %v327_v21 = vld [vmem:[#allocation2 + $0x28] sm:$0xff]  ;;  %v328_v22 = vld [vmem:[#allocation2 + $0x30] sm:$0xff] }
  0x7b   : > { %v329_v23 = vld [vmem:[#allocation2 + $0x38] sm:$0xff]  ;;  %v1038_v24 = vld [vmem:[#allocation3] sm:$0xff]   ;;  %v1039_v49 = vld [vmem:[#allocation3 + $0x8] sm:$0xff]  }
  0x7c   : > { %890 = vmatpush3.bf16.msra.mxu0 %v1031_v9  ;;  %935 = vmatprep.mubr.bf16.mxu1 %v1038_v24  ;;  %v1040_v50 = vld [vmem:[#allocation3 + $0x10] sm:$0xff]   ;;  %v1041_v51 = vld [vmem:[#allocation3 + $0x18] sm:$0xff]   ;;  %v1042_v52 = vld [vmem:[#allocation3 + $0x20] sm:$0xff]  }
  0x7d   : > { %891 = vmatprep.subr.bf16.mxu0 %v1032_v10  ;;  %v1043_v53 = vld [vmem:[#allocation3 + $0x28] sm:$0xff]   ;;  %v1044_v54 = vld [vmem:[#allocation3 + $0x30] sm:$0xff]   ;;  %v1045_v55 = vld [vmem:[#allocation3 + $0x38] sm:$0xff]  }
  0x7e   : > { %v839_v56 = vld [vmem:[%s244_s9] ss:$0 sm:$0xff] }
  0x80   : > { %892 = vmatpush3.bf16.msra.mxu0 %v1032_v10 }
  0x81   : > { %893 = vmatprep.subr.bf16.mxu0 %v1033_v11 }
  0x84   : > { %894 = vmatpush3.bf16.msra.mxu0 %v1033_v11 }
  0x85   : > { %895 = vmatprep.subr.bf16.mxu0 %v1034_v13 }
  0x88   : > { %896 = vmatpush3.bf16.msra.mxu0 %v1034_v13 }
  0x89   : > { %897 = vmatprep.subr.bf16.mxu0 %v1035_v14 }
  0x8c   : > { %898 = vmatpush3.bf16.msra.mxu0 %v1035_v14 }
  0x8d   : > { %899 = vmatprep.subr.bf16.mxu0 %v1036_v15 }
  0x90   : > { %900 = vmatpush3.bf16.msra.mxu0 %v1036_v15 }
  0x91   : > { %901 = vmatprep.subr.bf16.mxu0 %v1037_v16 }
  0x94   : > { %902 = vmatpush3.bf16.msra.mxu0 %v1037_v16 }
  0x97   : > { %904 = vmatmul.mubr.bf16.vlgmr.msra.gmra.mrb[0].mxu0 %v323_v17 }
  0x98   : > { %907 = vmatprep.mubr.bf16.mxu0 %v324_v18 }
  0x9f   : > { %908 = vmatmul.mubr.bf16.gmra.mrb[4].mxu0 %v325_v19 }
  0xa0   : > { %911 = vmatprep.mubr.bf16.mxu0 %v326_v20 }
  0xa7   : > { %912 = vmatmul.mubr.bf16.gmra.mrb[8].mxu0 %v327_v21 }
  0xa8   : > { %915 = vmatprep.mubr.bf16.mxu0 %v328_v22 }
  0xaf   : > { %916 = vmatmul.mubr.bf16.gmra.mrb[12].mxu0 %v329_v23 }
 0x16a   : > { %v905_v25 = vpop.f32.mrb[0].mxu0 }
 0x16b   : > { %v428_v26 = vpop.f32.mrb[1].mxu0 }
 0x16c   : > { %v906_v27 = vpop.f32.mrb[2].mxu0 }
 0x16d   : > { %v508_v28 = vpack.c.bf16 %v906_v27, %v905_v25  ;;  %v431_v29 = vpop.f32.mrb[3].mxu0 }
 0x16e   : > { %v507_v30 = vpack.c.bf16 %v431_v29, %v428_v26 }
 0x170   : > { %919 = vmatprep.subr.bf16.mxu1 %v507_v30 }
 0x171   : > { %920 = vmatpush3.bf16.msra.mxu1 %v507_v30 }
 0x172   : > { %v909_v31 = vpop.f32.mrb[4].mxu0  ;;  %921 = vmatprep.subr.bf16.mxu1 %v508_v28 }
 0x173   : > { %v444_v32 = vpop.f32.mrb[5].mxu0 }
 0x174   : > { %v910_v33 = vpop.f32.mrb[6].mxu0 }
 0x175   : > { %v510_v34 = vpack.c.bf16 %v910_v33, %v909_v31  ;;  %v447_v35 = vpop.f32.mrb[7].mxu0  ;;  %922 = vmatpush3.bf16.msra.mxu1 %v508_v28 }
 0x176   : > { %v509_v36 = vpack.c.bf16 %v447_v35, %v444_v32 }
 0x178   : > { %923 = vmatprep.subr.bf16.mxu1 %v509_v36 }
 0x179   : > { %924 = vmatpush3.bf16.msra.mxu1 %v509_v36 }
 0x17a   : > { %v913_v37 = vpop.f32.mrb[8].mxu0  ;;  %925 = vmatprep.subr.bf16.mxu1 %v510_v34 }
 0x17b   : > { %v460_v38 = vpop.f32.mrb[9].mxu0 }
 0x17c   : > { %v914_v39 = vpop.f32.mrb[10].mxu0 }
 0x17d   : > { %v512_v40 = vpack.c.bf16 %v914_v39, %v913_v37  ;;  %v463_v41 = vpop.f32.mrb[11].mxu0  ;;  %926 = vmatpush3.bf16.msra.mxu1 %v510_v34 }
 0x17e   : > { %v511_v42 = vpack.c.bf16 %v463_v41, %v460_v38 }
 0x180   : > { %927 = vmatprep.subr.bf16.mxu1 %v511_v42 }
 0x181   : > { %928 = vmatpush3.bf16.msra.mxu1 %v511_v42 }
 0x182   : > { %v917_v43 = vpop.f32.mrb[12].mxu0  ;;  %929 = vmatprep.subr.bf16.mxu1 %v512_v40 }
 0x183   : > { %v476_v44 = vpop.f32.mrb[13].mxu0 }
 0x184   : > { %v918_v45 = vpop.f32.mrb[14].mxu0 }
 0x185   : > { %v514_v46 = vpack.c.bf16 %v918_v45, %v917_v43  ;;  %v479_v47 = vpop.f32.mrb[15].mxu0  ;;  %930 = vmatpush3.bf16.msra.mxu1 %v512_v40 }
 0x186   : > { %v513_v48 = vpack.c.bf16 %v479_v47, %v476_v44 }
 0x188   : > { %931 = vmatprep.subr.bf16.mxu1 %v513_v48 }
 0x189   : > { %932 = vmatpush3.bf16.msra.mxu1 %v513_v48 }
 0x18a   : > { %933 = vmatprep.subr.bf16.mxu1 %v514_v46 }
 0x18d   : > { %934 = vmatpush3.bf16.msra.mxu1 %v514_v46 }
 0x190   : > { %936 = vmatmul.mubr.bf16.vlgmr.msra.gmra.mrb[0].mxu1 %v1039_v49 }
 0x191   : > { %939 = vmatprep.mubr.bf16.mxu1 %v1040_v50 }
 0x198   : > { %940 = vmatmul.mubr.bf16.gmra.mrb[4].mxu1 %v1041_v51 }
 0x199   : > { %943 = vmatprep.mubr.bf16.mxu1 %v1042_v52 }
 0x1a0   : > { %944 = vmatmul.mubr.bf16.gmra.mrb[8].mxu1 %v1043_v53 }
 0x1a1   : > { %947 = vmatprep.mubr.bf16.mxu1 %v1044_v54 }
 0x1a8   : > { %948 = vmatmul.mubr.bf16.gmra.mrb[12].mxu1 %v1045_v55 }
 0x263   : > { %v937_v57 = vpop.f32.mrb[0].mxu1 }
 0x264   : > { %v1436_v58 = vadd.f32 %v937_v57, %v839_v56  ;;  %v604_v59 = vpop.f32.mrb[1].mxu1 }
 0x265   : > { %v1438_v60 = vadd.f32 %v839_v56, %v604_v59  ;;  %v938_v61 = vpop.f32.mrb[2].mxu1 }
 0x266   : > { %v1440_v62 = vadd.f32 %v938_v61, %v839_v56  ;;  %v607_v63 = vpop.f32.mrb[3].mxu1  ;;  %v673_v27 = vmax.f32 (!%p848_p11), %v1436_v58, 0.0 }
 0x267   : > { %v608_v0 = vadd.f32 %v839_v56, %v607_v63  ;;  %v671_v25 = vmax.f32 (!%p848_p11), %v1438_v60, 0.0 }
 0x268   : > { %v674_v28 = vmax.f32 (!%p848_p11), %v1440_v62, 0.0 }
 0x269   : > { %v672_v26 = vmax.f32 (!%p848_p11), %v608_v0, 0.0 }
 0x26a   : > { %v688_v34 = vpack.c.bf16 (!%p848_p11), %v674_v28, %v673_v27 }
 0x26b   : > { %v941_v1 = vpop.f32.mrb[4].mxu1  ;;  %v687_v33 = vpack.c.bf16 (!%p848_p11), %v672_v26, %v671_v25 }
 0x26c   : > { %v1442_v2 = vadd.f32 %v941_v1, %v839_v56  ;;  %v620_v3 = vpop.f32.mrb[5].mxu1  ;;  %696 = vst [vmem:[#allocation2 + $0x8] sm:$0xff] (!%p848_p11), %v688_v34 }
 0x26d   : > { %v621_v4 = vadd.f32 %v839_v56, %v620_v3  ;;  %v942_v5 = vpop.f32.mrb[6].mxu1  ;;  %695 = vst [vmem:[#allocation2] sm:$0xff] (!%p848_p11), %v687_v33 }
 0x26e   : > { %v632_v6 = vadd.f32 %v942_v5, %v839_v56  ;;  %v623_v7 = vpop.f32.mrb[7].mxu1  ;;  %v677_v31 = vmax.f32 (!%p848_p11), %v1442_v2, 0.0 }
 0x26f   : > { %v624_v8 = vadd.f32 %v839_v56, %v623_v7  ;;  %v675_v29 = vmax.f32 (!%p848_p11), %v621_v4, 0.0 }
 0x270   : > { %v678_v32 = vmax.f32 (!%p848_p11), %v632_v6, 0.0 }
 0x271   : > { %v676_v30 = vmax.f32 (!%p848_p11), %v624_v8, 0.0 }
 0x272   : > { %v690_v38 = vpack.c.bf16 (!%p848_p11), %v678_v32, %v677_v31 }
 0x273   : > { %v945_v9 = vpop.f32.mrb[8].mxu1  ;;  %v689_v37 = vpack.c.bf16 (!%p848_p11), %v676_v30, %v675_v29 }
 0x274   : > { %v645_v10 = vadd.f32 %v945_v9, %v839_v56  ;;  %v636_v11 = vpop.f32.mrb[9].mxu1  ;;  %698 = vst [vmem:[#allocation2 + $0x18] sm:$0xff] (!%p848_p11), %v690_v38 }
 0x275   : > { %v637_v12 = vadd.f32 %v839_v56, %v636_v11  ;;  %v946_v13 = vpop.f32.mrb[10].mxu1  ;;  %697 = vst [vmem:[#allocation2 + $0x10] sm:$0xff] (!%p848_p11), %v689_v37 }
 0x276   : > { %v648_v14 = vadd.f32 %v946_v13, %v839_v56  ;;  %v639_v15 = vpop.f32.mrb[11].mxu1  ;;  %v681_v39 = vmax.f32 (!%p848_p11), %v645_v10, 0.0 }
 0x277   : > { %v640_v16 = vadd.f32 %v839_v56, %v639_v15  ;;  %v679_v35 = vmax.f32 (!%p848_p11), %v637_v12, 0.0 }
 0x278   : > { %v682_v40 = vmax.f32 (!%p848_p11), %v648_v14, 0.0 }
 0x279   : > { %670 = sbr.rel (%p848_p11) target bundleno = 646 (0x286), region = 56  ;;  %v680_v36 = vmax.f32 (!%p848_p11), %v640_v16, 0.0 }
 0x27a   : > { %v692_v45 = vpack.c.bf16 (!%p848_p11), %v682_v40, %v681_v39 }
 0x27b   : > { %v949_v17 = vpop.f32.mrb[12].mxu1  ;;  %v691_v41 = vpack.c.bf16 (!%p848_p11), %v680_v36, %v679_v35 }
 0x27c   : > { %v661_v18 = vadd.f32 %v949_v17, %v839_v56  ;;  %v652_v19 = vpop.f32.mrb[13].mxu1  ;;  %700 = vst [vmem:[#allocation2 + $0x28] sm:$0xff] (!%p848_p11), %v692_v45 }
 0x27d   : > { %v653_v20 = vadd.f32 %v839_v56, %v652_v19  ;;  %v950_v21 = vpop.f32.mrb[14].mxu1  ;;  %699 = vst [vmem:[#allocation2 + $0x20] sm:$0xff] (!%p848_p11), %v691_v41 }
 0x27e   : > { %v664_v22 = vadd.f32 %v950_v21, %v839_v56  ;;  %v655_v23 = vpop.f32.mrb[15].mxu1  ;;  %v685_v44 = vmax.f32 (!%p848_p11), %v661_v18, 0.0 }
 0x27f   : > { %v656_v24 = vadd.f32 %v839_v56, %v655_v23  ;;  %v683_v42 = vmax.f32 (!%p848_p11), %v653_v20, 0.0 }
 0x280   : > { %v686_v46 = vmax.f32 %v664_v22, 0.0 }
 0x281   : > { %v684_v43 = vmax.f32 %v656_v24, 0.0 }
 0x282   : > { %v694_v48 = vpack.c.bf16 %v686_v46, %v685_v44 }
 0x283   : > { %v693_v47 = vpack.c.bf16 %v684_v43, %v683_v42 }
 0x284   : > { %702 = vst [vmem:[#allocation2 + $0x38] sm:$0xff] %v694_v48 }
 0x285   : > { %701 = vst [vmem:[#allocation2 + $0x30] sm:$0xff] %v693_v47 }
 0x286 PF: > { %p849_p13 = scmp.ne.s32.totalorder %s1258_s19, 2 }
 0x287   : > { %707 = vst [vmem:[#allocation9] sm:$0xff] (!%p849_p13), %v1438_v60  ;;  %708 = vst [vmem:[#allocation9 + $0x8] sm:$0xff] (!%p849_p13), %v608_v0 }
 0x288   : > { %706 = sbr.rel (%p849_p13) target bundleno = 655 (0x28f), region = 60  ;;  %709 = vst [vmem:[#allocation9 + $0x10] sm:$0xff] (!%p849_p13), %v1436_v58  ;;  %710 = vst [vmem:[#allocation9 + $0x18] sm:$0xff] (!%p849_p13), %v1440_v62 }
 0x289   : > { %711 = vst [vmem:[#allocation9 + $0x20] sm:$0xff] (!%p849_p13), %v621_v4  ;;  %712 = vst [vmem:[#allocation9 + $0x28] sm:$0xff] (!%p849_p13), %v624_v8 }
 0x28a   : > { %713 = vst [vmem:[#allocation9 + $0x30] sm:$0xff] (!%p849_p13), %v1442_v2  ;;  %714 = vst [vmem:[#allocation9 + $0x38] sm:$0xff] (!%p849_p13), %v632_v6 }
 0x28b   : > { %715 = vst [vmem:[#allocation9 + $0x40] sm:$0xff] (!%p849_p13), %v637_v12  ;;  %716 = vst [vmem:[#allocation9 + $0x48] sm:$0xff] (!%p849_p13), %v640_v16 }
 0x28c   : > { %717 = vst [vmem:[#allocation9 + $0x50] sm:$0xff] (!%p849_p13), %v645_v10  ;;  %718 = vst [vmem:[#allocation9 + $0x58] sm:$0xff] (!%p849_p13), %v648_v14 }
 0x28d   : > { %719 = vst [vmem:[#allocation9 + $0x60] sm:$0xff] (!%p849_p13), %v653_v20  ;;  %720 = vst [vmem:[#allocation9 + $0x68] sm:$0xff] (!%p849_p13), %v656_v24 }
 0x28e   : > { %721 = vst [vmem:[#allocation9 + $0x70] sm:$0xff] (!%p849_p13), %v661_v18  ;;  %722 = vst [vmem:[#allocation9 + $0x78] sm:$0xff] (!%p849_p13), %v664_v22 }
 0x28f PF: > { %p981_p12 = scmp.eq.s32.totalorder %s1258_s19, 2  ;;  %s1211_s11 = smov [#allocation9]  }
 0x290   : > { %s729_s18 = sshll.u32 %s1211_s11, 4  ;;  %s730_s18 = int_to_ptr.vmem [resolvable:$true] %s729_s18 }
 0x291   : > { %s1132_s24 = scalar_lea.vmem %s730_s18, 2048  ;;  %p1139_p5 = scmp.lt.s32.totalorder %s730_s18, %s730_s18 }
 0x292   : > { %p1133_p8 = scmp.ne.s32.totalorder %s730_s18, %s1132_s24  ;;  %p1140_p9 = scmp.lt.s32.totalorder %s1132_s24, %s1132_s24 }
 0x294   : > { %p1134_p10 = pnand %p1133_p8, %p981_p12  ;;  %p1141_p1 = por %p1140_p9, %p1139_p5 }
 0x296   : > { %p1135_p0 = pneg %p1134_p10 }
 0x298   : > { %p1142_p3 = pnand %p1141_p1, %p1135_p0 }
 0x29a   : > { %1145 = shalt.err (!%p1142_p3)
}
 0x29b   : > { %s1146_s15 = scalar_lea.hbm %s1494_s4, 2048 }
 0x29c   : > { %p1147_p6 = scmp.ne.s32.totalorder %s1494_s4, %s1146_s15  ;;  %p1152_p7 = scmp.lt.u32.totalorder %s1146_s15, %s1494_s4 }
 0x29e   : > { %p1148_p2 = pnand %p1147_p6, %p981_p12 }
 0x2a0   : > { %p1149_p4 = pneg %p1148_p2 }
 0x2a2   : > { %p1154_p11 = pnand %p1152_p7, %p1149_p4 }
 0x2a4   : > { %1157 = shalt.err (!%p1154_p11)
}
 0x2a5   : > { %s1212_s30 = smov 128   ;;  %s1213_s13 = smov 8  }
 0x2a6   : > { %962 = dma.vmem_to_hbm [thread:$0]  (%p981_p12), %s730_s18, 2048, %s1494_s4, [#allocation5], %s1212_s30, %s1212_s30, %s1213_s13  }
 0x2a7   : > { %1187 = dma.done.wait (%p981_p12), [#allocation5], 2048  }
 0x2a8   : > { %1189 = vsyncadd (%p981_p12), [#allocation5], 4294965248 }
 0x2a9 PF: > { %p14_p13 = scmp.ge.s32.totalorder %s1261_s20, 5   ;;  %s1512_s15 = smov %s1196_s16 }
 0x2aa   : > { %s1513_s16 = smov %s1200_s17  ;;  %s1514_s17 = smov %s1271_s23 }
 0x2ab   : > { %s1515_s18 = smov %s1261_s20  ;;  %16 = sbr.rel (!%p14_p13) target bundleno = 4 (0x4), region = 95 }
 0x2b2   :  { %745 = vsyncpa [#allocation4], 1 }
 0x2b3   :  { %747 = vsyncpa [#allocation4 + $0x1], 1 }
 0x2b4   :  { %748 = vsyncpa [#allocation7], 1 }
 0x2b5   :  { %749 = vsyncpa [#allocation5], 1 }
 0x2b6   :  { %751 = vsyncpa [#allocation5 + $0x1], 1 }

</bundles_post_ra>
